<compile_context>
chip_gen: v7x
topology: tpu7x:2x2x1
jax: 0.10.0
libtpu: 0.0.40
codegen_flags: <defaults>
</compile_context>

<pallas_src>
import functools

import numpy as np
import jax
import jax.numpy as jnp
from jax.experimental import pallas as pl
from jax.experimental.pallas import tpu as pltpu


# --------------------------------------------------------------------------
# Pallas kernel: one (C, TILE) block, channels on sublanes, pixels on lanes.
# --------------------------------------------------------------------------
def _hoaf_kernel(x_ref, w_ref, b_ref, o_ref, *, pair_a, pair_b, has1, has2):
    x = x_ref[...].astype(jnp.float32)                     # (C, T)
    C = x.shape[0]
    if has2:
        # Sublane-broadcast every channel row once; reused by all pairs below.
        bc = [jnp.broadcast_to(x[c:c + 1, :], x.shape) for c in range(C)]
        # Start from the folded (conv2 bias * beta2) column, lane-broadcast.
        acc = jnp.broadcast_to(b_ref[...].astype(jnp.float32), x.shape)
        # Unrolled pairwise products + folded shuffle/grouped-conv2/beta2 mix.
        for d in range(len(pair_a)):
            prod = bc[pair_a[d]] * bc[pair_b[d]]           # (C, T) VPU multiply
            acc = acc + w_ref[:, d:d + 1].astype(jnp.float32) * prod
    else:
        acc = jnp.zeros_like(x)
    if has1:
        acc = acc + x                                      # power-1 residual
    o_ref[...] = acc.astype(o_ref.dtype)                   # lane-dense store


def _pick_tile(hw, max_tile=4096):
    """Largest multiple of 128 that divides hw (capped); else full extent."""
    if hw % 128 != 0:
        return hw                       # full-extent block is always legal
    t = min(max_tile, hw)
    t = (t // 128) * 128
    while hw % t != 0:
        t -= 128
    return t


# --------------------------------------------------------------------------
# Wrapper: folds the structural permutations / weights once, calls pallas_call
# --------------------------------------------------------------------------
def hoaf_v3_pallas(inp, conv2_w, conv2_b, beta2, num_groups, num_pow,
                   max_tile=4096):
    B, C, H, W = inp.shape
    G = num_groups
    P = C // G
    has1 = 1 in num_pow
    has2 = 2 in num_pow

    pairs = [(i, j) for i in range(P) for j in range(i, P)]
    npairs = len(pairs)                  # out_channels2 (per group)
    D = npairs * G                       # channels of the concatenated products

    # channel_shuffle(inp, P): shuffled1[s] = inp[(s % P)*G + s//P]
    def perm1(s):
        return (s % P) * G + s // P

    # source channels of every pairwise-product channel (cat channel pi*G + k)
    A, Bs = [], []
    for pi, (i, j) in enumerate(pairs):
        for k in range(G):
            A.append(perm1(i * G + k))
            Bs.append(perm1(j * G + k))

    # fold channel_shuffle(cat, G) + grouped conv2 + beta2 + bias into
    #   W_t (C, D)  and  bias_col (C, 1)
    w_np = np.asarray(conv2_w, np.float32)                 # (C, npairs)
    b_np = np.asarray(conv2_b, np.float32)                 # (C,)
    beta_np = np.asarray(beta2, np.float32).reshape(C)     # (C,)
    W_t = np.zeros((C, D), np.float32)
    for g in range(G):
        for p in range(P):
            c_out = g * P + p
            for inner in range(npairs):
                s2 = g * npairs + inner                    # shuffled2 channel
                c_cat = (s2 % G) * npairs + s2 // G        # -> cat channel
                W_t[c_out, c_cat] = w_np[c_out, inner]
    W_t = W_t * beta_np[:, None]
    bias_col = (b_np * beta_np)[:, None]                   # (C, 1)

    # NCHW -> (B, C, H*W): free view, no data movement.
    HW = H * W
    x3 = inp.reshape(B, C, HW)
    TILE = _pick_tile(HW, max_tile)
    grid = (B, HW // TILE)

    kernel = functools.partial(_hoaf_kernel,
                               pair_a=tuple(A), pair_b=tuple(Bs),
                               has1=has1, has2=has2)

    out3 = pl.pallas_call(
        kernel,
        out_shape=jax.ShapeDtypeStruct((B, C, HW), inp.dtype),
        grid_spec=pltpu.PrefetchScalarGridSpec(
            num_scalar_prefetch=0,
            grid=grid,
            in_specs=[
                pl.BlockSpec((None, C, TILE), lambda b, i: (b, 0, i)),  # x tile
                pl.BlockSpec((C, D), lambda b, i: (0, 0)),   # folded weights
                pl.BlockSpec((C, 1), lambda b, i: (0, 0)),   # folded bias
            ],
            out_specs=pl.BlockSpec((None, C, TILE), lambda b, i: (b, 0, i)),
        ),
        compiler_params=pltpu.CompilerParams(
            dimension_semantics=("parallel", "parallel")),
    )(x3, jnp.asarray(W_t), jnp.asarray(bias_col))

    return out3.reshape(B, C, H, W)


# --------------------------------------------------------------------------
# Pure-JAX reference (mirrors the PyTorch forward exactly) for verification
# --------------------------------------------------------------------------
def _channel_shuffle_ref(x, groups):
    B, C, H, W = x.shape
    x = x.reshape(B, groups, C // groups, H, W)
    x = jnp.swapaxes(x, 1, 2)
    return x.reshape(B, C, H, W)


def hoaf_v3_ref(inp, conv2_w, conv2_b, beta2, num_groups, num_pow):
    B, C, H, W = inp.shape
    P = C // num_groups
    npairs = P * (P + 1) // 2
    shuffled = _channel_shuffle_ref(inp, P)
    chunks = jnp.split(shuffled, P, axis=1)                # each (B, G, H, W)
    prods = []
    for i in range(P):
        for j in range(i, P):
            prods.append(chunks[i] * chunks[j])
    out = jnp.zeros_like(inp)
    if 1 in num_pow:
        out = out + inp
    if 2 in num_pow:
        cat = jnp.concatenate(prods, axis=1)
        shuffled2 = _channel_shuffle_ref(cat, num_groups)
        outs = []
        for g in range(num_groups):
            xin = shuffled2[:, g * npairs:(g + 1) * npairs]          # (B,npairs,H,W)
            wg = conv2_w[g * P:(g + 1) * P]                          # (P, npairs)
            og = jnp.einsum('bnhw,pn->bphw', xin, wg)
            og = og + conv2_b[g * P:(g + 1) * P][None, :, None, None]
            outs.append(og)
        conv_out = jnp.concatenate(outs, axis=1)
        out = out + conv_out * beta2
    return out


# --------------------------------------------------------------------------
if __name__ == "__main__":
    key = jax.random.PRNGKey(0)
    B, C, H, W = 2, 8, 16, 16
    num_groups = 2
    num_pow = (1, 2)
    P = C // num_groups
    npairs = P * (P + 1) // 2          # out_channels2 per group

    k1, k2, k3 = jax.random.split(key, 3)
    inp = jax.random.normal(k1, (B, C, H, W), jnp.float32)
    # conv2: nn.Conv2d(npairs*G, C, 1, groups=G) -> weight (C, npairs, 1, 1), bias (C,)
    conv2_w = jax.random.normal(k2, (C, npairs), jnp.float32) * 0.1
    conv2_b = jax.random.normal(k3, (C,), jnp.float32) * 0.1
    beta2 = jnp.ones((1, C, 1, 1), jnp.float32)            # as in __init__
    # NOTE: conv1 is defined in __init__ but never used in forward(), so it is omitted.

    out = hoaf_v3_pallas(inp, conv2_w, conv2_b, beta2, num_groups, num_pow)
    out = jax.block_until_ready(out)

    ref = hoaf_v3_ref(inp, conv2_w, conv2_b, beta2, num_groups, num_pow)
    np.testing.assert_allclose(np.asarray(out), np.asarray(ref), rtol=1e-5, atol=1e-5)
    print("KERNEL_OK")
</pallas_src>

<mosaic_0001>
module attributes {stable_mosaic.version = 11 : i64} {
  func.func @_hoaf_kernel(%arg0: i32, %arg1: i32, %arg2: memref<1x8x256xf32, #tpu.memory_space<vmem>>, %arg3: memref<8x20xf32, #tpu.memory_space<vmem>>, %arg4: memref<8x1xf32, #tpu.memory_space<vmem>>, %arg5: memref<1x8x256xf32, #tpu.memory_space<vmem>>) attributes {dimension_semantics = [#tpu.dimension_semantics<parallel>, #tpu.dimension_semantics<parallel>], iteration_bounds = array<i64: 2, 1>, scalar_prefetch = 0 : i64, scratch_operands = 0 : i64, tpu.core_type = #tpu.core_type<tc>, window_params = [{transform_indices = @transform_0, window_bounds = array<i64: 1, 8, 256>}, {pipeline_mode = #tpu.pipeline_mode<synchronous>, transform_indices = @transform_1, window_bounds = array<i64: 8, 20>}, {pipeline_mode = #tpu.pipeline_mode<synchronous>, transform_indices = @transform_2, window_bounds = array<i64: 8, 1>}, {transform_indices = @transform_3, window_bounds = array<i64: 1, 8, 256>}]} {
    %c0 = arith.constant 0 : index
    %c0_0 = arith.constant 0 : index
    %c0_1 = arith.constant 0 : index
    %0 = vector.load %arg2[%c0, %c0_0, %c0_1] : memref<1x8x256xf32, #tpu.memory_space<vmem>>, vector<1x8x256xf32>
    %1 = vector.shape_cast %0 : vector<1x8x256xf32> to vector<8x256xf32>
    %2 = vector.extract_strided_slice %1 {offsets = [0, 0], sizes = [1, 256], strides = [1, 1]} : vector<8x256xf32> to vector<1x256xf32>
    %3 = vector.shape_cast %2 : vector<1x256xf32> to vector<1x256xf32>
    %4 = vector.broadcast %3 : vector<1x256xf32> to vector<8x256xf32>
    %5 = vector.extract_strided_slice %1 {offsets = [1, 0], sizes = [1, 256], strides = [1, 1]} : vector<8x256xf32> to vector<1x256xf32>
    %6 = vector.shape_cast %5 : vector<1x256xf32> to vector<1x256xf32>
    %7 = vector.broadcast %6 : vector<1x256xf32> to vector<8x256xf32>
    %8 = vector.extract_strided_slice %1 {offsets = [2, 0], sizes = [1, 256], strides = [1, 1]} : vector<8x256xf32> to vector<1x256xf32>
    %9 = vector.shape_cast %8 : vector<1x256xf32> to vector<1x256xf32>
    %10 = vector.broadcast %9 : vector<1x256xf32> to vector<8x256xf32>
    %11 = vector.extract_strided_slice %1 {offsets = [3, 0], sizes = [1, 256], strides = [1, 1]} : vector<8x256xf32> to vector<1x256xf32>
    %12 = vector.shape_cast %11 : vector<1x256xf32> to vector<1x256xf32>
    %13 = vector.broadcast %12 : vector<1x256xf32> to vector<8x256xf32>
    %14 = vector.extract_strided_slice %1 {offsets = [4, 0], sizes = [1, 256], strides = [1, 1]} : vector<8x256xf32> to vector<1x256xf32>
    %15 = vector.shape_cast %14 : vector<1x256xf32> to vector<1x256xf32>
    %16 = vector.broadcast %15 : vector<1x256xf32> to vector<8x256xf32>
    %17 = vector.extract_strided_slice %1 {offsets = [5, 0], sizes = [1, 256], strides = [1, 1]} : vector<8x256xf32> to vector<1x256xf32>
    %18 = vector.shape_cast %17 : vector<1x256xf32> to vector<1x256xf32>
    %19 = vector.broadcast %18 : vector<1x256xf32> to vector<8x256xf32>
    %20 = vector.extract_strided_slice %1 {offsets = [6, 0], sizes = [1, 256], strides = [1, 1]} : vector<8x256xf32> to vector<1x256xf32>
    %21 = vector.shape_cast %20 : vector<1x256xf32> to vector<1x256xf32>
    %22 = vector.broadcast %21 : vector<1x256xf32> to vector<8x256xf32>
    %23 = vector.extract_strided_slice %1 {offsets = [7, 0], sizes = [1, 256], strides = [1, 1]} : vector<8x256xf32> to vector<1x256xf32>
    %24 = vector.shape_cast %23 : vector<1x256xf32> to vector<1x256xf32>
    %25 = vector.broadcast %24 : vector<1x256xf32> to vector<8x256xf32>
    %c0_2 = arith.constant 0 : index
    %c0_3 = arith.constant 0 : index
    %26 = vector.load %arg4[%c0_2, %c0_3] : memref<8x1xf32, #tpu.memory_space<vmem>>, vector<8x1xf32>
    %27 = vector.shape_cast %26 : vector<8x1xf32> to vector<8x1xf32>
    %28 = vector.broadcast %27 : vector<8x1xf32> to vector<8x256xf32>
    %29 = arith.mulf %4, %4 : vector<8x256xf32>
    %c0_4 = arith.constant 0 : index
    %c0_5 = arith.constant 0 : index
    %30 = vector.load %arg3[%c0_4, %c0_5] : memref<8x20xf32, #tpu.memory_space<vmem>>, vector<8x1xf32>
    %31 = vector.broadcast %30 : vector<8x1xf32> to vector<8x256xf32>
    %32 = arith.mulf %31, %29 : vector<8x256xf32>
    %33 = arith.addf %28, %32 : vector<8x256xf32>
    %34 = arith.mulf %10, %10 : vector<8x256xf32>
    %c0_6 = arith.constant 0 : index
    %c1 = arith.constant 1 : index
    %35 = vector.load %arg3[%c0_6, %c1] : memref<8x20xf32, #tpu.memory_space<vmem>>, vector<8x1xf32>
    %36 = vector.broadcast %35 : vector<8x1xf32> to vector<8x256xf32>
    %37 = arith.mulf %36, %34 : vector<8x256xf32>
    %38 = arith.addf %33, %37 : vector<8x256xf32>
    %39 = arith.mulf %4, %16 : vector<8x256xf32>
    %c0_7 = arith.constant 0 : index
    %c2 = arith.constant 2 : index
    %40 = vector.load %arg3[%c0_7, %c2] : memref<8x20xf32, #tpu.memory_space<vmem>>, vector<8x1xf32>
    %41 = vector.broadcast %40 : vector<8x1xf32> to vector<8x256xf32>
    %42 = arith.mulf %41, %39 : vector<8x256xf32>
    %43 = arith.addf %38, %42 : vector<8x256xf32>
    %44 = arith.mulf %10, %22 : vector<8x256xf32>
    %c0_8 = arith.constant 0 : index
    %c3 = arith.constant 3 : index
    %45 = vector.load %arg3[%c0_8, %c3] : memref<8x20xf32, #tpu.memory_space<vmem>>, vector<8x1xf32>
    %46 = vector.broadcast %45 : vector<8x1xf32> to vector<8x256xf32>
    %47 = arith.mulf %46, %44 : vector<8x256xf32>
    %48 = arith.addf %43, %47 : vector<8x256xf32>
    %49 = arith.mulf %4, %7 : vector<8x256xf32>
    %c0_9 = arith.constant 0 : index
    %c4 = arith.constant 4 : index
    %50 = vector.load %arg3[%c0_9, %c4] : memref<8x20xf32, #tpu.memory_space<vmem>>, vector<8x1xf32>
    %51 = vector.broadcast %50 : vector<8x1xf32> to vector<8x256xf32>
    %52 = arith.mulf %51, %49 : vector<8x256xf32>
    %53 = arith.addf %48, %52 : vector<8x256xf32>
    %54 = arith.mulf %10, %13 : vector<8x256xf32>
    %c0_10 = arith.constant 0 : index
    %c5 = arith.constant 5 : index
    %55 = vector.load %arg3[%c0_10, %c5] : memref<8x20xf32, #tpu.memory_space<vmem>>, vector<8x1xf32>
    %56 = vector.broadcast %55 : vector<8x1xf32> to vector<8x256xf32>
    %57 = arith.mulf %56, %54 : vector<8x256xf32>
    %58 = arith.addf %53, %57 : vector<8x256xf32>
    %59 = arith.mulf %4, %19 : vector<8x256xf32>
    %c0_11 = arith.constant 0 : index
    %c6 = arith.constant 6 : index
    %60 = vector.load %arg3[%c0_11, %c6] : memref<8x20xf32, #tpu.memory_space<vmem>>, vector<8x1xf32>
    %61 = vector.broadcast %60 : vector<8x1xf32> to vector<8x256xf32>
    %62 = arith.mulf %61, %59 : vector<8x256xf32>
    %63 = arith.addf %58, %62 : vector<8x256xf32>
    %64 = arith.mulf %10, %25 : vector<8x256xf32>
    %c0_12 = arith.constant 0 : index
    %c7 = arith.constant 7 : index
    %65 = vector.load %arg3[%c0_12, %c7] : memref<8x20xf32, #tpu.memory_space<vmem>>, vector<8x1xf32>
    %66 = vector.broadcast %65 : vector<8x1xf32> to vector<8x256xf32>
    %67 = arith.mulf %66, %64 : vector<8x256xf32>
    %68 = arith.addf %63, %67 : vector<8x256xf32>
    %69 = arith.mulf %16, %16 : vector<8x256xf32>
    %c0_13 = arith.constant 0 : index
    %c8 = arith.constant 8 : index
    %70 = vector.load %arg3[%c0_13, %c8] : memref<8x20xf32, #tpu.memory_space<vmem>>, vector<8x1xf32>
    %71 = vector.broadcast %70 : vector<8x1xf32> to vector<8x256xf32>
    %72 = arith.mulf %71, %69 : vector<8x256xf32>
    %73 = arith.addf %68, %72 : vector<8x256xf32>
    %74 = arith.mulf %22, %22 : vector<8x256xf32>
    %c0_14 = arith.constant 0 : index
    %c9 = arith.constant 9 : index
    %75 = vector.load %arg3[%c0_14, %c9] : memref<8x20xf32, #tpu.memory_space<vmem>>, vector<8x1xf32>
    %76 = vector.broadcast %75 : vector<8x1xf32> to vector<8x256xf32>
    %77 = arith.mulf %76, %74 : vector<8x256xf32>
    %78 = arith.addf %73, %77 : vector<8x256xf32>
    %79 = arith.mulf %16, %7 : vector<8x256xf32>
    %c0_15 = arith.constant 0 : index
    %c10 = arith.constant 10 : index
    %80 = vector.load %arg3[%c0_15, %c10] : memref<8x20xf32, #tpu.memory_space<vmem>>, vector<8x1xf32>
    %81 = vector.broadcast %80 : vector<8x1xf32> to vector<8x256xf32>
    %82 = arith.mulf %81, %79 : vector<8x256xf32>
    %83 = arith.addf %78, %82 : vector<8x256xf32>
    %84 = arith.mulf %22, %13 : vector<8x256xf32>
    %c0_16 = arith.constant 0 : index
    %c11 = arith.constant 11 : index
    %85 = vector.load %arg3[%c0_16, %c11] : memref<8x20xf32, #tpu.memory_space<vmem>>, vector<8x1xf32>
    %86 = vector.broadcast %85 : vector<8x1xf32> to vector<8x256xf32>
    %87 = arith.mulf %86, %84 : vector<8x256xf32>
    %88 = arith.addf %83, %87 : vector<8x256xf32>
    %89 = arith.mulf %16, %19 : vector<8x256xf32>
    %c0_17 = arith.constant 0 : index
    %c12 = arith.constant 12 : index
    %90 = vector.load %arg3[%c0_17, %c12] : memref<8x20xf32, #tpu.memory_space<vmem>>, vector<8x1xf32>
    %91 = vector.broadcast %90 : vector<8x1xf32> to vector<8x256xf32>
    %92 = arith.mulf %91, %89 : vector<8x256xf32>
    %93 = arith.addf %88, %92 : vector<8x256xf32>
    %94 = arith.mulf %22, %25 : vector<8x256xf32>
    %c0_18 = arith.constant 0 : index
    %c13 = arith.constant 13 : index
    %95 = vector.load %arg3[%c0_18, %c13] : memref<8x20xf32, #tpu.memory_space<vmem>>, vector<8x1xf32>
    %96 = vector.broadcast %95 : vector<8x1xf32> to vector<8x256xf32>
    %97 = arith.mulf %96, %94 : vector<8x256xf32>
    %98 = arith.addf %93, %97 : vector<8x256xf32>
    %99 = arith.mulf %7, %7 : vector<8x256xf32>
    %c0_19 = arith.constant 0 : index
    %c14 = arith.constant 14 : index
    %100 = vector.load %arg3[%c0_19, %c14] : memref<8x20xf32, #tpu.memory_space<vmem>>, vector<8x1xf32>
    %101 = vector.broadcast %100 : vector<8x1xf32> to vector<8x256xf32>
    %102 = arith.mulf %101, %99 : vector<8x256xf32>
    %103 = arith.addf %98, %102 : vector<8x256xf32>
    %104 = arith.mulf %13, %13 : vector<8x256xf32>
    %c0_20 = arith.constant 0 : index
    %c15 = arith.constant 15 : index
    %105 = vector.load %arg3[%c0_20, %c15] : memref<8x20xf32, #tpu.memory_space<vmem>>, vector<8x1xf32>
    %106 = vector.broadcast %105 : vector<8x1xf32> to vector<8x256xf32>
    %107 = arith.mulf %106, %104 : vector<8x256xf32>
    %108 = arith.addf %103, %107 : vector<8x256xf32>
    %109 = arith.mulf %7, %19 : vector<8x256xf32>
    %c0_21 = arith.constant 0 : index
    %c16 = arith.constant 16 : index
    %110 = vector.load %arg3[%c0_21, %c16] : memref<8x20xf32, #tpu.memory_space<vmem>>, vector<8x1xf32>
    %111 = vector.broadcast %110 : vector<8x1xf32> to vector<8x256xf32>
    %112 = arith.mulf %111, %109 : vector<8x256xf32>
    %113 = arith.addf %108, %112 : vector<8x256xf32>
    %114 = arith.mulf %13, %25 : vector<8x256xf32>
    %c0_22 = arith.constant 0 : index
    %c17 = arith.constant 17 : index
    %115 = vector.load %arg3[%c0_22, %c17] : memref<8x20xf32, #tpu.memory_space<vmem>>, vector<8x1xf32>
    %116 = vector.broadcast %115 : vector<8x1xf32> to vector<8x256xf32>
    %117 = arith.mulf %116, %114 : vector<8x256xf32>
    %118 = arith.addf %113, %117 : vector<8x256xf32>
    %119 = arith.mulf %19, %19 : vector<8x256xf32>
    %c0_23 = arith.constant 0 : index
    %c18 = arith.constant 18 : index
    %120 = vector.load %arg3[%c0_23, %c18] : memref<8x20xf32, #tpu.memory_space<vmem>>, vector<8x1xf32>
    %121 = vector.broadcast %120 : vector<8x1xf32> to vector<8x256xf32>
    %122 = arith.mulf %121, %119 : vector<8x256xf32>
    %123 = arith.addf %118, %122 : vector<8x256xf32>
    %124 = arith.mulf %25, %25 : vector<8x256xf32>
    %c0_24 = arith.constant 0 : index
    %c19 = arith.constant 19 : index
    %125 = vector.load %arg3[%c0_24, %c19] : memref<8x20xf32, #tpu.memory_space<vmem>>, vector<8x1xf32>
    %126 = vector.broadcast %125 : vector<8x1xf32> to vector<8x256xf32>
    %127 = arith.mulf %126, %124 : vector<8x256xf32>
    %128 = arith.addf %123, %127 : vector<8x256xf32>
    %129 = arith.addf %128, %1 : vector<8x256xf32>
    %c0_25 = arith.constant 0 : index
    %c0_26 = arith.constant 0 : index
    %c0_27 = arith.constant 0 : index
    %130 = vector.load %arg5[%c0_25, %c0_26, %c0_27] : memref<1x8x256xf32, #tpu.memory_space<vmem>>, vector<1x8x256xf32>
    %131 = vector.shape_cast %130 : vector<1x8x256xf32> to vector<8x256xf32>
    %132 = vector.shape_cast %129 : vector<8x256xf32> to vector<1x8x256xf32>
    tpu.vector_store %arg5[%c0_25, %c0_26, %c0_27], %132 {strides = array<i32>} : memref<1x8x256xf32, #tpu.memory_space<vmem>>, vector<1x8x256xf32>,
    return
  }
  func.func @transform_0(%arg0: i32, %arg1: i32) -> (i32, i32, i32) {
    %c0_i32 = arith.constant 0 : i32
    %c0_i32_0 = arith.constant 0 : i32
    return %arg0, %c0_i32, %arg1 : i32, i32, i32
  }
  func.func @transform_1(%arg0: i32, %arg1: i32) -> (i32, i32) {
    %c0_i32 = arith.constant 0 : i32
    %c0_i32_0 = arith.constant 0 : i32
    %c0_i32_1 = arith.constant 0 : i32
    return %c0_i32, %c0_i32_0 : i32, i32
  }
  func.func @transform_2(%arg0: i32, %arg1: i32) -> (i32, i32) {
    %c0_i32 = arith.constant 0 : i32
    %c0_i32_0 = arith.constant 0 : i32
    %c0_i32_1 = arith.constant 0 : i32
    return %c0_i32, %c0_i32_0 : i32, i32
  }
  func.func @transform_3(%arg0: i32, %arg1: i32) -> (i32, i32, i32) {
    %c0_i32 = arith.constant 0 : i32
    %c0_i32_0 = arith.constant 0 : i32
    return %arg0, %c0_i32, %arg1 : i32, i32, i32
  }
}

</mosaic_0001>

<bundles_post_ra>
// kernel: tpu_custom_call.1
= control target key start
LH: loop header
LB: loop body
LE: loop exit
PB: predicated region body
PF: predicated region fallthrough
CT: control target
= control target key end

     0   :  { %8 = vsyncpa [#allocation3], 0  ;;  %s1164_s0 = inlined_call_operand.hbm [shape: f32[2,8,256], index: 0, kind: input, shape index: {}]   ;;  %s1165_s1 = inlined_call_operand.vmem [shape: f32[8,20], index: 1, kind: input, shape index: {}]   ;;  %s1166_s2 = inlined_call_operand.vmem [shape: f32[8,1], index: 2, kind: input, shape index: {}]   ;;  %s1167_s3 = inlined_call_operand.hbm [shape: f32[2,8,256], index: 3, kind: output, shape index: {}]  }
   0x1   :  { %10 = vsyncpa [#allocation3 + $0x1], 0 }
   0x2   :  { %11 = vsyncpa [#allocation4], 0 }
   0x3   :  { %13 = vsyncpa [#allocation4 + $0x1], 0  ;;  %s862_s12 = smov 0   ;;  %s864_s13 = smov 0  }
   0x4   :  { %s866_s14 = smov 0   ;;  %s868_s15 = smov 0  }
   0x5   :  { %s870_s16 = smov 0   ;;  %s872_s17 = smov 0  }
   0x6 LB: > { %s586_s18 = sadd.s32 4294967295, %s818_s17   ;;  %s587_s19 = sadd.s32 4294967294, %s818_s17   ;;  %s818_s17 = sphi %s872_s17, %s19_s17   ;;  %s814_s16 = sphi %s870_s16, %s1183_s16   ;;  %s810_s15 = sphi %s868_s15, %s1182_s15   ;;  %s806_s14 = sphi %s866_s14, %s1181_s14   ;;  %s802_s13 = sphi %s864_s13, %s1180_s13   ;;  %s798_s12 = sphi %s862_s12, %s1179_s12  }
   0x7   : > { %s31_s20 = sadd.s32 1, %s814_s16  ;;  %s40_s21 = sadd.s32 1, %s806_s14 }
   0x8   : > { %p33_p0 = scmp.ge.s32.totalorder %s31_s20, 2  ;;  %p47_p1 = scmp.ne.s32.totalorder %s806_s14, %s802_s13 }
   0x9   : > { %p48_p2 = scmp.eq.s32.totalorder %s818_s17, 0  ;;  %p53_p3 = scmp.ne.s32.totalorder %s802_s13, %s798_s12 }
   0xa   : > { %s1185_s20 = smov (%p33_p0, %s31_s20), 0  ;;  %p54_p5 = scmp.eq.s32.totalorder %s586_s18, 0 }
   0xb   : > { %p903_p4 = por %p48_p2, %p47_p1  ;;  %s35_s23 = ssub.s32 %s814_s16, %s1185_s20 }
   0xc   : > { %p121_p6 = scmp.eq.s32.totalorder %s586_s18, 1  ;;  %p38_p7 = scmp.eq.s32.totalorder %s35_s23, 0 }
   0xd   : > { %p909_p8 = por %p54_p5, %p53_p3  ;;  %p127_p10 = scmp.eq.s32.totalorder %s587_s19, 1 }
   0xe   : > { %p913_p9 = por %p121_p6, %p47_p1  ;;  %p615_p13 = scmp.lt.s32.totalorder %s818_s17, 2 }
   0xf   : > { %s918_s26 = scalar_select %p38_p7, %s806_s14, %s40_s21  }
  0x10   : > { %s1171_s25 = scalar_select %p913_p9, 1, 0 }
  0x11   : > { %p920_p11 = por %p127_p10, %p53_p3  ;;  %s153_s28 = sand.u32 1, %s806_s14  }
  0x12   : > { %s590_s29 = sshll.u32 %s153_s28, 4  ;;  %s601_s30 = sshll.u32 %s814_s16, 8 }
  0x13   : > { %s1172_s27 = scalar_select %p920_p11, 1, 0 }
  0x14   : > { %s931_s6 = scalar_lea.hbm %s1164_s0, %s601_s30  ;;  %s157_s7 = scalar_lea.vmem [#allocation2], %s590_s29 }
  0x15   : > { %s167_s8 = sshll.u32 %s157_s7, 4  ;;  %p937_p0 = pnand %p615_p13, %p903_p4  ;;  %s933_s8 = int_to_ptr.vmem [resolvable:$true] %s167_s8 }
  0x16   : > { %s154_s10 = scalar_lea.sflag [#allocation3], %s153_s28  ;;  %s706_s11 = scalar_lea.hbm %s931_s6, 256 }
  0x17   : > { %p707_p3 = scmp.ne.s32.totalorder %s931_s6, %s706_s11  ;;  %p708_p5 = pneg %p937_p0 }
  0x18   : > { %s711_s21 = scalar_lea.hbm %s1164_s0, 512  ;;  %p712_p4 = scmp.lt.u32.totalorder %s931_s6, %s1164_s0 }
  0x19   : > { %p709_p6 = pnand %p708_p5, %p707_p3  ;;  %p713_p10 = scmp.lt.u32.totalorder %s711_s21, %s706_s11 }
  0x1a   : > { %p715_p12 = scmp.lt.u32.totalorder %s706_s11, %s931_s6 }
  0x1b   : > { %p710_p7 = pneg %p709_p6  ;;  %p714_p13 = por %p713_p10, %p712_p4 }
  0x1d   : > { %p716_p1 = por %p715_p12, %p714_p13 }
  0x1f   : > { %p717_p2 = pnand %p716_p1, %p710_p7 }
  0x21   : > { %720 = shalt.err (!%p717_p2)
}
  0x22   : > { %s721_s28 = scalar_lea.vmem %s933_s8, 256  ;;  %s820_s29 = smov [#allocation2]  }
  0x23   : > { %p722_p3 = scmp.ne.s32.totalorder %s933_s8, %s721_s28  ;;  %s726_s30 = sshll.u32 %s820_s29, 4  ;;  %s727_s30 = int_to_ptr.vmem [resolvable:$false] %s726_s30 }
  0x24   : > { %s728_s4 = scalar_lea.vmem %s727_s30, 512  ;;  %p729_p9 = scmp.lt.s32.totalorder %s933_s8, %s727_s30 }
  0x25   : > { %p724_p6 = pnand %p722_p3, %p708_p5  ;;  %p730_p4 = scmp.lt.s32.totalorder %s728_s4, %s721_s28 }
  0x27   : > { %p725_p11 = pneg %p724_p6  ;;  %p731_p10 = por %p730_p4, %p729_p9 }
  0x29   : > { %p732_p12 = pnand %p731_p10, %p725_p11 }
  0x2b   : > { %735 = shalt.err (!%p732_p12)
}
  0x2c   : > { %610 = dma.hbm_to_vmem [thread:$0]  (!%p937_p0), %s931_s6, 256, %s933_s8, %s154_s10  }
  0x2d   : > { %p1174_p1 = scmp.lt.s32.totalorder %s818_s17, 3  ;;  %p1175_p2 = scmp.ge.s32.totalorder %s818_s17, 1 }
  0x2f   : > { %p173_p5 = pnand %p1175_p2, %p1174_p1 }
  0x30   : > { %s973_s5 = sand.u32 (!%p173_p5), 1, %s802_s13  }
  0x31   : > { %176 = sbr.rel (%p173_p5) target bundleno = 267 (0x10b), region = 32  ;;  %s594_s7 = sshll.u32 (!%p173_p5), %s973_s5, 4 }
  0x32   : > { %s179_s11 = scalar_lea.sflag (!%p173_p5), [#allocation3], %s973_s5  ;;  %s979_s9 = scalar_lea.vmem (!%p173_p5), [#allocation2], %s594_s7 }
  0x38   : > { %789 = dma.done.wait (%p909_p8), %s179_s11, 256  }
  0x39   : > { %791 = vsyncadd (%p909_p8), %s179_s11, 4294967040  ;;  %v821_v0 = vmov 1   ;;  %v822_v1 = vmov 0   ;;  %v281_v2 = vld [vmem:[%s1165_s1] sm:$0xff]  ;;  %v823_v4 = vmov 2   ;;  %v824_v5 = vmov 3  }
  0x3a   : > { %686 = vset.pattern.permute.xlu1 %v821_v0  ;;  %685 = vset.pattern.permute.xlu0 %v822_v1  ;;  %v273_v3 = vld [vmem:[%s1166_s2] sm:$0xff]  ;;  %v825_v6 = vmov 4   ;;  %v826_v7 = vmov 6   ;;  %v827_v8 = vmov 5   ;;  %v828_v9 = vmov 9   ;;  %v998_v26 = vld [vmem:[%s979_s9 + $0x8] sm:$0xff] }
  0x3b   : > { %294 = vperm.xlu1 %686, %v281_v2   ;;  %284 = vperm.xlu0 %685, %v281_v2   ;;  %v829_v10 = vmov 7   ;;  %v830_v11 = vmov 12   ;;  %v831_v12 = vmov 8   ;;  %v832_v13 = vmov 15   ;;  %v995_v25 = vld [vmem:[%s979_s9] sm:$0xff]  ;;  %s602_s24 = sshll.u32 %s810_s15, 8 }
  0x3c   : > { %v833_v14 = vmov 10   ;;  %v834_v15 = vmov 18   ;;  %v835_v16 = vmov 11   ;;  %v836_v17 = vmov 19   ;;  %s204_s19 = scalar_lea.vmem [#allocation5], %s594_s7  ;;  %s1115_s28 = scalar_lea.hbm %s1167_s3, %s602_s24 }
  0x3d   : > { %v837_v18 = vmov 13   ;;  %v838_v19 = vmov 14   ;;  %v839_v20 = vmov 16   ;;  %v840_v21 = vmov 17   ;;  %s502_s21 = sshll.u32 %s204_s19, 4  ;;  %s486_s15 = scalar_lea.sflag [#allocation4], %s973_s5  ;;  %s1117_s21 = int_to_ptr.vmem [resolvable:$true] %s502_s21 }
  0x3e   : > { %v209_v22 = vlaneseq  ;;  %s736_s29 = scalar_lea.vmem %s1117_s21, 256  ;;  %p1176_p9 = scmp.ne.s32.totalorder %s1171_s25, 0 }
  0x3f   : > { %687 = vset.pattern.permute.xlu1 %v823_v4  ;;  %276 = vperm.xlu0 %685, %v273_v3   ;;  %p737_p8 = scmp.ne.s32.totalorder %s1117_s21, %s736_s29  ;;  %s841_s30 = smov [#allocation5]  }
  0x40   : > { %304 = vperm.xlu1 %687, %v281_v2   ;;  %v991_v23 = vshrl.u32 %v209_v22, 7  ;;  %s740_s4 = sshll.u32 %s841_s30, 4  ;;  %s741_s4 = int_to_ptr.vmem [resolvable:$false] %s740_s4 }
  0x41   : > { %p738_p11 = pnand %p737_p8, %p1176_p9  ;;  %s742_s7 = scalar_lea.vmem %s741_s4, 512 }
  0x42   : > { %v211_v24 = vsub.s32 0, %v991_v23  ;;  %v227_v27 = vsub.s32 2, %v991_v23  ;;  %v243_v30 = vsub.s32 4, %v991_v23  ;;  %v259_v31 = vsub.s32 6, %v991_v23  ;;  %p743_p7 = scmp.lt.s32.totalorder %s1117_s21, %s741_s4  ;;  %p744_p13 = scmp.lt.s32.totalorder %s742_s7, %s736_s29 }
  0x43   : > { %688 = vset.pattern.permute.xlu0 %v824_v5  ;;  %v219_v41 = vsub.s32 1, %v991_v23  ;;  %v235_v49 = vsub.s32 3, %v991_v23  ;;  %v251_v62 = vsub.s32 5, %v991_v23  ;;  %p739_p0 = pneg %p738_p11 }
  0x44   : > { %689 = vset.pattern.permute.xlu1 %v825_v6  ;;  %314 = vperm.xlu0 %688, %v281_v2   ;;  %v212_v28 = vrot.slane %v995_v25, %v211_v24  ;;  %v216_v29 = vrot.slane %v998_v26, %v211_v24  ;;  %v228_v32 = vrot.slane %v995_v25, %v227_v27  ;;  %p745_p3 = por %p744_p13, %p743_p7 }
  0x45   : > { %324 = vperm.xlu1 %689, %v281_v2   ;;  %v232_v33 = vrot.slane %v998_v26, %v227_v27  ;;  %v1008_v36 = vrot.slane %v995_v25, %v243_v30  ;;  %v1011_v37 = vrot.slane %v998_v26, %v243_v30  ;;  %v1014_v40 = vrot.slane %v995_v25, %v259_v31 }
  0x46   : > { %v279_v34 = vmul.f32 %v212_v28, %v212_v28  ;;  %v280_v35 = vmul.f32 %v216_v29, %v216_v29  ;;  %v291_v42 = vmul.f32 %v228_v32, %v228_v32  ;;  %v1020_v48 = vrot.slane %v998_v26, %v259_v31  ;;  %p746_p6 = pnand %p745_p3, %p739_p0 }
  0x47   : > { %v292_v43 = vmul.f32 %v232_v33, %v232_v33  ;;  %v301_v46 = vmul.f32 %v1008_v36, %v212_v28  ;;  %v302_v47 = vmul.f32 %v1011_v37, %v216_v29  ;;  %v311_v51 = vmul.f32 %v1014_v40, %v228_v32 }
  0x48   : > { %691 = vset.pattern.permute.xlu0 %v826_v7  ;;  %v1025_v52 = vrot.slane %v995_v25, %v219_v41  ;;  %v1028_v53 = vrot.slane %v998_v26, %v219_v41  ;;  %v312_v61 = vmul.f32 %v1020_v48, %v232_v33  ;;  %v1033_v1 = vrot.slane %v995_v25, %v235_v49 }
  0x49   : > { %690 = vset.pattern.permute.xlu1 %v827_v8  ;;  %344 = vperm.xlu0 %691, %v281_v2   ;;  %v267_v8 = vsub.s32 7, %v991_v23 }
  0x4a   : > { %334 = vperm.xlu1 %690, %v281_v2   ;;  %v321_v3 = vmul.f32 %v1025_v52, %v212_v28  ;;  %v322_v4 = vmul.f32 %v1028_v53, %v216_v29 }
  0x4d   : > { %694 = vset.pattern.permute.xlu0 %v828_v9 }
  0x4e   : > { %692 = vset.pattern.permute.xlu1 %v829_v10  ;;  %374 = vperm.xlu0 %694, %v281_v2  }
  0x4f   : > { %354 = vperm.xlu1 %692, %v281_v2  }
  0x52   : > { %697 = vset.pattern.permute.xlu0 %v830_v11 }
  0x53   : > { %693 = vset.pattern.permute.xlu1 %v831_v12  ;;  %404 = vperm.xlu0 %697, %v281_v2   ;;  %v1042_v12 = vrot.slane %v995_v25, %v251_v62 }
  0x54   : > { %364 = vperm.xlu1 %693, %v281_v2  }
  0x55   : > { %v341_v22 = vmul.f32 %v1042_v12, %v212_v28  ;;  %v361_v28 = vmul.f32 %v1008_v36, %v1008_v36 }
  0x57   : > { %700 = vset.pattern.permute.xlu0 %v832_v13  ;;  %v1045_v13 = vrot.slane %v998_v26, %v251_v62 }
  0x58   : > { %695 = vset.pattern.permute.xlu1 %v833_v14  ;;  %434 = vperm.xlu0 %700, %v281_v2   ;;  %v331_v14 = vmul.f32 %v1033_v1, %v228_v32 }
  0x59   : > { %384 = vperm.xlu1 %695, %v281_v2   ;;  %v342_v23 = vmul.f32 %v1045_v13, %v216_v29  ;;  %v362_v29 = vmul.f32 %v1011_v37, %v1011_v37 }
  0x5c   : > { %703 = vset.pattern.permute.xlu0 %v834_v15 }
  0x5d   : > { %696 = vset.pattern.permute.xlu1 %v835_v16  ;;  %464 = vperm.xlu0 %703, %v281_v2  }
  0x5e   : > { %394 = vperm.xlu1 %696, %v281_v2  }
  0x61   : > { %705 = vset.pattern.permute.xlu0 %v836_v17 }
  0x62   : > { %698 = vset.pattern.permute.xlu1 %v837_v18 }
  0x63   : > { %414 = vperm.xlu1 %698, %v281_v2  }
  0x67   : > { %699 = vset.pattern.permute.xlu1 %v838_v19 }
  0x68   : > { %424 = vperm.xlu1 %699, %v281_v2  }
  0x6c   : > { %701 = vset.pattern.permute.xlu1 %v839_v20  ;;  %v1050_v20 = vrot.slane %v995_v25, %v267_v8 }
  0x6d   : > { %444 = vperm.xlu1 %701, %v281_v2  }
  0x71   : > { %702 = vset.pattern.permute.xlu1 %v840_v21  ;;  %v1053_v21 = vrot.slane %v998_v26, %v267_v8 }
  0x72   : > { %454 = vperm.xlu1 %702, %v281_v2  }
  0x76   : > { %704 = vset.pattern.permute.xlu1 %v836_v17 }
  0x77   : > { %474 = vperm.xlu1 %704, %v281_v2   ;;  %v1036_v2 = vrot.slane %v998_v26, %v235_v49 }
  0x79   : > { %v332_v15 = vmul.f32 %v1036_v2, %v232_v33 }
  0xba   : > { %v295_v38 = vpop.permute.xlu1 %294  ;;  %v285_v39 = vpop.permute.xlu0 %284 }
  0xbb   : > { %v287_v44 = vmul.f32 %v285_v39, %v279_v34  ;;  %v288_v45 = vmul.f32 %v285_v39, %v280_v35  ;;  %v297_v54 = vmul.f32 %v295_v38, %v291_v42  ;;  %v298_v55 = vmul.f32 %v295_v38, %v292_v43 }
  0xbc   : > { %v351_v38 = vmul.f32 %v1050_v20, %v228_v32  ;;  %v352_v39 = vmul.f32 %v1053_v21, %v232_v33  ;;  %v371_v32 = vmul.f32 %v1014_v40, %v1014_v40  ;;  %v372_v33 = vmul.f32 %v1020_v48, %v1020_v48 }
  0xbe   : > { %v277_v50 = vpop.permute.xlu0 %276 }
  0xbf   : > { %v289_v56 = vadd.f32 %v287_v44, %v277_v50  ;;  %v290_v57 = vadd.f32 %v288_v45, %v277_v50  ;;  %v305_v58 = vpop.permute.xlu1 %304 }
  0xc0   : > { %v307_v59 = vmul.f32 %v305_v58, %v301_v46  ;;  %v308_v60 = vmul.f32 %v305_v58, %v302_v47 }
  0xc1   : > { %v299_v63 = vadd.f32 %v297_v54, %v289_v56  ;;  %v300_v0 = vadd.f32 %v298_v55, %v290_v57 }
  0xc3   : > { %v309_v5 = vadd.f32 %v307_v59, %v299_v63  ;;  %v310_v6 = vadd.f32 %v308_v60, %v300_v0  ;;  %v315_v7 = vpop.permute.xlu0 %314  ;;  %v381_v59 = vmul.f32 %v1008_v36, %v1025_v52  ;;  %v382_v60 = vmul.f32 %v1011_v37, %v1028_v53 }
  0xc4   : > { %v317_v9 = vmul.f32 %v315_v7, %v311_v51  ;;  %v318_v10 = vmul.f32 %v315_v7, %v312_v61  ;;  %v325_v11 = vpop.permute.xlu1 %324 }
  0xc5   : > { %v327_v18 = vmul.f32 %v325_v11, %v321_v3  ;;  %v328_v19 = vmul.f32 %v325_v11, %v322_v4  ;;  %v391_v4 = vmul.f32 %v1014_v40, %v1033_v1  ;;  %v402_v11 = vmul.f32 %v1045_v13, %v1011_v37 }
  0xc6   : > { %v319_v16 = vadd.f32 %v317_v9, %v309_v5  ;;  %v320_v17 = vadd.f32 %v318_v10, %v310_v6  ;;  %v392_v5 = vmul.f32 %v1020_v48, %v1036_v2  ;;  %v401_v10 = vmul.f32 %v1042_v12, %v1008_v36 }
  0xc7   : > { %v421_v37 = vmul.f32 %v1025_v52, %v1025_v52 }
  0xc8   : > { %v345_v27 = vpop.permute.xlu0 %344  ;;  %v329_v30 = vadd.f32 %v327_v18, %v319_v16  ;;  %v330_v31 = vadd.f32 %v328_v19, %v320_v17 }
  0xc9   : > { %v335_v24 = vpop.permute.xlu1 %334  ;;  %v347_v43 = vmul.f32 %v345_v27, %v341_v22  ;;  %v348_v44 = vmul.f32 %v345_v27, %v342_v23  ;;  %v411_v22 = vmul.f32 %v1050_v20, %v1014_v40  ;;  %v412_v23 = vmul.f32 %v1053_v21, %v1020_v48 }
  0xca   : > { %v337_v34 = vmul.f32 %v335_v24, %v331_v14  ;;  %v338_v35 = vmul.f32 %v335_v24, %v332_v15  ;;  %v431_v40 = vmul.f32 %v1033_v1, %v1033_v1  ;;  %v432_v48 = vmul.f32 %v1036_v2, %v1036_v2 }
  0xcc   : > { %v339_v41 = vadd.f32 %v337_v34, %v329_v30  ;;  %v340_v42 = vadd.f32 %v338_v35, %v330_v31  ;;  %v422_v34 = vmul.f32 %v1028_v53, %v1028_v53 }
  0xcd   : > { %v375_v54 = vpop.permute.xlu0 %374 }
  0xce   : > { %v355_v45 = vpop.permute.xlu1 %354  ;;  %v349_v46 = vadd.f32 %v347_v43, %v339_v41  ;;  %v350_v47 = vadd.f32 %v348_v44, %v340_v42  ;;  %v377_v63 = vmul.f32 %v375_v54, %v371_v32  ;;  %v378_v0 = vmul.f32 %v375_v54, %v372_v33 }
  0xcf   : > { %v357_v49 = vmul.f32 %v355_v45, %v351_v38  ;;  %v358_v50 = vmul.f32 %v355_v45, %v352_v39  ;;  %v451_v54 = vmul.f32 %v1050_v20, %v1033_v1 }
  0xd1   : > { %v359_v55 = vadd.f32 %v357_v49, %v349_v46  ;;  %v360_v56 = vadd.f32 %v358_v50, %v350_v47  ;;  %v441_v46 = vmul.f32 %v1042_v12, %v1025_v52  ;;  %v442_v47 = vmul.f32 %v1045_v13, %v1028_v53 }
  0xd2   : > { %v405_v15 = vpop.permute.xlu0 %404  ;;  %v462_v52 = vmul.f32 %v1045_v13, %v1045_v13  ;;  %v472_v13 = vmul.f32 %v1053_v21, %v1053_v21 }
  0xd3   : > { %v365_v51 = vpop.permute.xlu1 %364  ;;  %v407_v30 = vmul.f32 %v405_v15, %v401_v10  ;;  %v408_v31 = vmul.f32 %v405_v15, %v402_v11 }
  0xd4   : > { %v367_v57 = vmul.f32 %v365_v51, %v361_v28  ;;  %v368_v58 = vmul.f32 %v365_v51, %v362_v29 }
  0xd6   : > { %v369_v61 = vadd.f32 %v367_v57, %v359_v55  ;;  %v370_v62 = vadd.f32 %v368_v58, %v360_v56  ;;  %v452_v55 = vmul.f32 %v1053_v21, %v1036_v2  ;;  %v461_v56 = vmul.f32 %v1042_v12, %v1042_v12 }
  0xd7   : > { %v435_v43 = vpop.permute.xlu0 %434  ;;  %v471_v12 = vmul.f32 %v1050_v20, %v1050_v20 }
  0xd8   : > { %v385_v3 = vpop.permute.xlu1 %384  ;;  %v379_v6 = vadd.f32 %v377_v63, %v369_v61  ;;  %v380_v7 = vadd.f32 %v378_v0, %v370_v62  ;;  %v437_v32 = vmul.f32 %v435_v43, %v431_v40  ;;  %v438_v33 = vmul.f32 %v435_v43, %v432_v48 }
  0xd9   : > { %v387_v8 = vmul.f32 %v385_v3, %v381_v59  ;;  %v388_v9 = vmul.f32 %v385_v3, %v382_v60 }
  0xdb   : > { %v389_v16 = vadd.f32 %v387_v8, %v379_v6  ;;  %v390_v17 = vadd.f32 %v388_v9, %v380_v7 }
  0xdc   : > { %v465_v60 = vpop.permute.xlu0 %464 }
  0xdd   : > { %v395_v14 = vpop.permute.xlu1 %394  ;;  %v467_v62 = vmul.f32 %v465_v60, %v461_v56  ;;  %v468_v63 = vmul.f32 %v465_v60, %v462_v52 }
  0xde   : > { %v397_v18 = vmul.f32 %v395_v14, %v391_v4  ;;  %v398_v19 = vmul.f32 %v395_v14, %v392_v5 }
  0xe0   : > { %v399_v24 = vadd.f32 %v397_v18, %v389_v16  ;;  %v400_v27 = vadd.f32 %v398_v19, %v390_v17 }
  0xe2   : > { %v415_v36 = vpop.permute.xlu1 %414  ;;  %v409_v35 = vadd.f32 %v407_v30, %v399_v24  ;;  %v410_v38 = vadd.f32 %v408_v31, %v400_v27 }
  0xe3   : > { %v417_v39 = vmul.f32 %v415_v36, %v411_v22  ;;  %v418_v41 = vmul.f32 %v415_v36, %v412_v23 }
  0xe5   : > { %v419_v44 = vadd.f32 %v417_v39, %v409_v35  ;;  %v420_v45 = vadd.f32 %v418_v41, %v410_v38 }
  0xe7   : > { %v425_v42 = vpop.permute.xlu1 %424 }
  0xe8   : > { %v427_v28 = vmul.f32 %v425_v42, %v421_v37  ;;  %v428_v29 = vmul.f32 %v425_v42, %v422_v34 }
  0xea   : > { %v429_v49 = vadd.f32 %v427_v28, %v419_v44  ;;  %v430_v50 = vadd.f32 %v428_v29, %v420_v45 }
  0xec   : > { %v445_v51 = vpop.permute.xlu1 %444  ;;  %v439_v57 = vadd.f32 %v437_v32, %v429_v49  ;;  %v440_v58 = vadd.f32 %v438_v33, %v430_v50 }
  0xed   : > { %v447_v53 = vmul.f32 %v445_v51, %v441_v46  ;;  %v448_v59 = vmul.f32 %v445_v51, %v442_v47 }
  0xef   : > { %v449_v1 = vadd.f32 %v447_v53, %v439_v57  ;;  %v450_v0 = vadd.f32 %v448_v59, %v440_v58 }
  0xf1   : > { %v455_v61 = vpop.permute.xlu1 %454 }
  0xf2   : > { %v457_v3 = vmul.f32 %v455_v61, %v451_v54  ;;  %v458_v2 = vmul.f32 %v455_v61, %v452_v55 }
  0xf4   : > { %v459_v4 = vadd.f32 %v457_v3, %v449_v1  ;;  %v460_v5 = vadd.f32 %v458_v2, %v450_v0 }
  0xf6   : > { %v469_v6 = vadd.f32 %v467_v62, %v459_v4  ;;  %v470_v7 = vadd.f32 %v468_v63, %v460_v5  ;;  %v475_v8 = vpop.permute.xlu1 %474 }
  0xf7   : > { %v477_v9 = vmul.f32 %v475_v8, %v471_v12  ;;  %v478_v10 = vmul.f32 %v475_v8, %v472_v13 }
  0xf9   : > { %v479_v11 = vadd.f32 %v477_v9, %v469_v6  ;;  %v480_v14 = vadd.f32 %v478_v10, %v470_v7 }
  0xfb   : > { %v481_v20 = vadd.f32 %v479_v11, %v995_v25  ;;  %v482_v15 = vadd.f32 %v480_v14, %v998_v26 }
  0xfd   : > { %483 = vst [vmem:[%s204_s19] sm:$0xff] %v481_v20  ;;  %484 = vst [vmem:[%s204_s19 + $0x8] sm:$0xff] %v482_v15 }
  0xfe   : > { %749 = shalt.err (!%p746_p6)
}
  0xff   : > { %s750_s5 = scalar_lea.hbm %s1115_s28, 256  ;;  %s754_s6 = scalar_lea.hbm %s1167_s3, 512 }
 0x100   : > { %p751_p4 = scmp.ne.s32.totalorder %s1115_s28, %s750_s5  ;;  %p755_p1 = scmp.lt.u32.totalorder %s1115_s28, %s1167_s3 }
 0x101   : > { %p756_p2 = scmp.lt.u32.totalorder %s754_s6, %s750_s5  ;;  %p758_p8 = scmp.lt.u32.totalorder %s750_s5, %s1115_s28 }
 0x102   : > { %p752_p10 = pnand %p751_p4, %p1176_p9 }
 0x103   : > { %p757_p5 = por %p756_p2, %p755_p1 }
 0x104   : > { %p753_p12 = pneg %p752_p10 }
 0x105   : > { %p759_p11 = por %p758_p8, %p757_p5 }
 0x107   : > { %p760_p0 = pnand %p759_p11, %p753_p12 }
 0x109   : > { %763 = shalt.err (!%p760_p0)
}
 0x10a   : > { %605 = dma.vmem_to_hbm [thread:$0]  (%p1176_p9), %s1117_s21, 256, %s1115_s28, %s486_s15  }
 0x10b PF: > { %s514_s18 = sand.u32 1, %s798_s12   ;;  %p1177_p7 = scmp.ne.s32.totalorder %s1172_s27, 0 }
 0x10c   : > { %p1178_p13 = scmp.ge.s32.totalorder %s818_s17, 2  ;;  %s515_s24 = scalar_lea.sflag [#allocation4], %s514_s18 }
 0x10e   : > { %p612_p3 = pnand %p1178_p13, %p1177_p7 }
 0x110   : > { %793 = dma.done.wait (!%p612_p3), %s515_s24, 256  }
 0x111   : > { %795 = vsyncadd (!%p612_p3), %s515_s24, 4294967040  ;;  %s19_s17 = sadd.s32 1, %s818_s17   ;;  %s1179_s12 = smov %s802_s13 }
 0x112   : > { %p16_p6 = scmp.ge.s32.totalorder %s19_s17, 4   ;;  %s1180_s13 = smov %s806_s14 }
 0x113   : > { %s1181_s14 = smov %s918_s26  ;;  %s1182_s15 = smov %s814_s16 }
 0x114   : > { %s1183_s16 = smov %s1185_s20  ;;  %18 = sbr.rel (!%p16_p6) target bundleno = 6 (0x6), region = 77 }
 0x11b   :  { %520 = vsyncpa [#allocation3], 1 }
 0x11c   :  { %522 = vsyncpa [#allocation3 + $0x1], 1 }
 0x11d   :  { %523 = vsyncpa [#allocation4], 1 }
 0x11e   :  { %525 = vsyncpa [#allocation4 + $0x1], 1 }

</bundles_post_ra>
